<compile_context>
chip_gen: v6e
topology: v6e:2x2x1
jax: 0.10.0
libtpu: 0.0.40
codegen_flags: <defaults>
</compile_context>

<pallas_src>
import jax
import jax.numpy as jnp
from jax.experimental import pallas as pl
from jax.experimental.pallas import tpu as pltpu

EPS = 1e-5  # PyTorch BatchNorm1d default eps


def mlp_adj_kernel(x_ref,
                   w1_ref, b1_ref, g1_ref, be1_ref,
                   w2_ref, b2_ref, g2_ref, be2_ref,
                   w3_ref, b3_ref, g3_ref, be3_ref,
                   w4_ref, b4_ref,
                   out_ref):
    """Channels-on-sublanes / points-on-lanes.

    x_ref: (C_in, R) with R = B*L on lanes.
    Weights: (C_out, C_in).  Per-channel vectors b/gamma/beta: (C_out, 1).
    out_ref: (8, R) — final 3 channels padded to 8 sublanes (sliced in wrapper).
    """

    def conv_bn_relu(h, w_ref, b_ref, g_ref, be_ref):
        # Conv1d(kernel_size=1)  ==  W @ H + b  (MXU consumes W directly,
        # no XLU transpose per layer).
        y = jnp.dot(w_ref[...], h, preferred_element_type=jnp.float32) + b_ref[...]
        # BatchNorm1d training-mode biased stats, per channel (reduce over lanes).
        mean = jnp.mean(y, axis=1, keepdims=True)                   # (C, 1)
        var = jnp.mean((y - mean) ** 2, axis=1, keepdims=True)      # (C, 1)
        # Fold the BN affine into a single per-channel scale/shift:
        # y_hat = y * scale + shift, 2 VPU ops on the big block.
        scale = g_ref[...] * jax.lax.rsqrt(var + EPS)               # (C, 1)
        shift = be_ref[...] - mean * scale                          # (C, 1)
        return jnp.maximum(y * scale + shift, 0.0)                  # ReLU

    h = x_ref[...]
    h = conv_bn_relu(h, w1_ref, b1_ref, g1_ref, be1_ref)
    h = conv_bn_relu(h, w2_ref, b2_ref, g2_ref, be2_ref)
    h = conv_bn_relu(h, w3_ref, b3_ref, g3_ref, be3_ref)
    # Final conv (output channels padded 3 -> 8) + tanh; lane-dense store.
    y = jnp.dot(w4_ref[...], h, preferred_element_type=jnp.float32) + b4_ref[...]
    out_ref[...] = jnp.tanh(y)


def init_params(latent_dim, key):
    """Deterministic synthetic parameters matching MLPAdj.__init__ shapes
    (PyTorch conventions: W (C_out, C_in), b (C_out,), bn gamma/beta (C,))."""
    ks = jax.random.split(key, 16)
    d, d2, d4 = latent_dim, latent_dim // 2, latent_dim // 4

    def w(k, co, ci):
        return jax.random.normal(k, (co, ci), jnp.float32) * (1.0 / jnp.sqrt(ci))

    def b(k, co):
        return jax.random.normal(k, (co,), jnp.float32) * 0.1

    params = (
        w(ks[0], d, d),  b(ks[1], d),
        1.0 + 0.1 * jax.random.normal(ks[2], (d,), jnp.float32),    # bn1 gamma
        0.1 * jax.random.normal(ks[3], (d,), jnp.float32),          # bn1 beta
        w(ks[4], d2, d), b(ks[5], d2),
        1.0 + 0.1 * jax.random.normal(ks[6], (d2,), jnp.float32),   # bn2 gamma
        0.1 * jax.random.normal(ks[7], (d2,), jnp.float32),         # bn2 beta
        w(ks[8], d4, d2), b(ks[9], d4),
        1.0 + 0.1 * jax.random.normal(ks[10], (d4,), jnp.float32),  # bn3 gamma
        0.1 * jax.random.normal(ks[11], (d4,), jnp.float32),        # bn3 beta
        w(ks[12], 3, d4), b(ks[13], 3),
    )
    return params


def mlp_adj_forward(x, params):
    """x: (B, latent_dim, L) float32  ->  (B, 3, L) float32."""
    (w1, b1, g1, be1, w2, b2, g2, be2, w3, b3, g3, be3, w4, b4) = params
    B, C, L = x.shape
    R = B * L

    # (B, C, L) -> (C, B*L): only the two small leading axes move; the big L
    # axis stays on lanes, so no lane relayout / HBM transpose of the bulk data.
    x_cr = jnp.transpose(x, (1, 0, 2)).reshape(C, R)

    col = lambda v: v.reshape(-1, 1)  # per-channel vectors as (C, 1) columns

    # Pad the final layer's 3 output channels to 8 sublanes (zeros); the
    # wrapper slices the first 3 rows back out.
    w4p = jnp.zeros((8, w4.shape[1]), w4.dtype).at[:3].set(w4)
    b4p = jnp.zeros((8,), b4.dtype).at[:3].set(b4)

    operands = (x_cr,
                w1, col(b1), col(g1), col(be1),
                w2, col(b2), col(g2), col(be2),
                w3, col(b3), col(g3), col(be3),
                w4p, col(b4p))

    out_pad = pl.pallas_call(
        mlp_adj_kernel,
        out_shape=jax.ShapeDtypeStruct((8, R), jnp.float32),
        in_specs=[pl.BlockSpec(memory_space=pltpu.MemorySpace.VMEM)] * len(operands),
        out_specs=pl.BlockSpec(memory_space=pltpu.MemorySpace.VMEM),
    )(*operands)

    # (8, R) -> keep 3 channels -> (3, B, L) -> (B, 3, L): only small axes move.
    return jnp.transpose(out_pad[:3].reshape(3, B, L), (1, 0, 2))


def _reference_forward(x, params):
    """Pure-JAX reference with identical semantics (for sanity checking)."""
    (w1, b1, g1, be1, w2, b2, g2, be2, w3, b3, g3, be3, w4, b4) = params
    B, C, L = x.shape
    h = jnp.transpose(x, (0, 2, 1)).reshape(B * L, C)

    def layer(h, w, b, g, be):
        y = h @ w.T + b
        m = jnp.mean(y, axis=0, keepdims=True)
        v = jnp.mean((y - m) ** 2, axis=0, keepdims=True)
        y = (y - m) / jnp.sqrt(v + EPS) * g + be
        return jnp.maximum(y, 0.0)

    h = layer(h, w1, b1, g1, be1)
    h = layer(h, w2, b2, g2, be2)
    h = layer(h, w3, b3, g3, be3)
    y = jnp.tanh(h @ w4.T + b4)
    return jnp.transpose(y.reshape(B, L, 3), (0, 2, 1))


if __name__ == "__main__":
    latent_dim = 32
    B, L = 2, 128  # batch, number of points

    key = jax.random.PRNGKey(0)
    kx, kp = jax.random.split(key)
    x = jax.random.normal(kx, (B, latent_dim, L), jnp.float32)
    params = init_params(latent_dim, kp)

    out = mlp_adj_forward(x, params)
    out = jax.block_until_ready(out)

    ref = _reference_forward(x, params)
    assert out.shape == (B, 3, L)
    assert jnp.allclose(out, ref, atol=1e-4, rtol=1e-4)

    print("KERNEL_OK")
</pallas_src>

<mosaic_0001>
module attributes {stable_mosaic.version = 11 : i64} {
  func.func @mlp_adj_kernel(%arg0: memref<32x256xf32, #tpu.memory_space<vmem>>, %arg1: memref<32x32xf32, #tpu.memory_space<vmem>>, %arg2: memref<32x1xf32, #tpu.memory_space<vmem>>, %arg3: memref<32x1xf32, #tpu.memory_space<vmem>>, %arg4: memref<32x1xf32, #tpu.memory_space<vmem>>, %arg5: memref<16x32xf32, #tpu.memory_space<vmem>>, %arg6: memref<16x1xf32, #tpu.memory_space<vmem>>, %arg7: memref<16x1xf32, #tpu.memory_space<vmem>>, %arg8: memref<16x1xf32, #tpu.memory_space<vmem>>, %arg9: memref<8x16xf32, #tpu.memory_space<vmem>>, %arg10: memref<8x1xf32, #tpu.memory_space<vmem>>, %arg11: memref<8x1xf32, #tpu.memory_space<vmem>>, %arg12: memref<8x1xf32, #tpu.memory_space<vmem>>, %arg13: memref<8x8xf32, #tpu.memory_space<vmem>>, %arg14: memref<8x1xf32, #tpu.memory_space<vmem>>, %arg15: memref<8x256xf32, #tpu.memory_space<vmem>>) attributes {dimension_semantics = [], scalar_prefetch = 0 : i64, scratch_operands = 0 : i64, tpu.core_type = #tpu.core_type<tc>} {
    %c0 = arith.constant 0 : index
    %c0_0 = arith.constant 0 : index
    %0 = vector.load %arg0[%c0, %c0_0] : memref<32x256xf32, #tpu.memory_space<vmem>>, vector<32x256xf32>
    %c0_1 = arith.constant 0 : index
    %c0_2 = arith.constant 0 : index
    %1 = vector.load %arg1[%c0_1, %c0_2] : memref<32x32xf32, #tpu.memory_space<vmem>>, vector<32x32xf32>
    %cst = arith.constant dense<0.000000e+00> : vector<32x256xf32>
    %2 = tpu.matmul %1, %0, %cst {dimension_numbers = #tpu.dot_dimension_numbers<[1], [0], [0], [1], [0, 0, 1, 1], [], []>} : vector<32x32xf32>, vector<32x256xf32>, vector<32x256xf32> -> vector<32x256xf32>
    %c0_3 = arith.constant 0 : index
    %c0_4 = arith.constant 0 : index
    %3 = vector.load %arg2[%c0_3, %c0_4] : memref<32x1xf32, #tpu.memory_space<vmem>>, vector<32x1xf32>
    %4 = vector.broadcast %3 : vector<32x1xf32> to vector<32x256xf32>
    %5 = arith.addf %2, %4 : vector<32x256xf32>
    %cst_5 = arith.constant dense<0.000000e+00> : vector<32xf32>
    %6 = vector.multi_reduction <add>, %5, %cst_5 [1] : vector<32x256xf32> to vector<32xf32>
    %7 = vector.shape_cast %6 : vector<32xf32> to vector<32x1xf32>
    %cst_6 = arith.constant 2.560000e+02 : f32
    %8 = vector.broadcast %cst_6 : f32 to vector<32x1xf32>
    %9 = arith.divf %7, %8 : vector<32x1xf32>
    %10 = vector.broadcast %9 : vector<32x1xf32> to vector<32x256xf32>
    %11 = arith.subf %5, %10 : vector<32x256xf32>
    %12 = arith.mulf %11, %11 : vector<32x256xf32>
    %cst_7 = arith.constant dense<0.000000e+00> : vector<32xf32>
    %13 = vector.multi_reduction <add>, %12, %cst_7 [1] : vector<32x256xf32> to vector<32xf32>
    %14 = vector.shape_cast %13 : vector<32xf32> to vector<32x1xf32>
    %cst_8 = arith.constant 2.560000e+02 : f32
    %15 = vector.broadcast %cst_8 : f32 to vector<32x1xf32>
    %16 = arith.divf %14, %15 : vector<32x1xf32>
    %c0_9 = arith.constant 0 : index
    %c0_10 = arith.constant 0 : index
    %17 = vector.load %arg3[%c0_9, %c0_10] : memref<32x1xf32, #tpu.memory_space<vmem>>, vector<32x1xf32>
    %cst_11 = arith.constant 9.99999974E-6 : f32
    %18 = vector.broadcast %cst_11 : f32 to vector<32x1xf32>
    %19 = arith.addf %16, %18 : vector<32x1xf32>
    %20 = math.rsqrt %19 : vector<32x1xf32>
    %21 = arith.mulf %17, %20 : vector<32x1xf32>
    %c0_12 = arith.constant 0 : index
    %c0_13 = arith.constant 0 : index
    %22 = vector.load %arg4[%c0_12, %c0_13] : memref<32x1xf32, #tpu.memory_space<vmem>>, vector<32x1xf32>
    %23 = arith.mulf %9, %21 : vector<32x1xf32>
    %24 = arith.subf %22, %23 : vector<32x1xf32>
    %25 = vector.broadcast %21 : vector<32x1xf32> to vector<32x256xf32>
    %26 = arith.mulf %5, %25 : vector<32x256xf32>
    %27 = vector.broadcast %24 : vector<32x1xf32> to vector<32x256xf32>
    %28 = arith.addf %26, %27 : vector<32x256xf32>
    %cst_14 = arith.constant 0.000000e+00 : f32
    %29 = vector.broadcast %cst_14 : f32 to vector<32x256xf32>
    %30 = arith.maximumf %28, %29 : vector<32x256xf32>
    %c0_15 = arith.constant 0 : index
    %c0_16 = arith.constant 0 : index
    %31 = vector.load %arg5[%c0_15, %c0_16] : memref<16x32xf32, #tpu.memory_space<vmem>>, vector<16x32xf32>
    %cst_17 = arith.constant dense<0.000000e+00> : vector<16x256xf32>
    %32 = tpu.matmul %31, %30, %cst_17 {dimension_numbers = #tpu.dot_dimension_numbers<[1], [0], [0], [1], [0, 0, 1, 1], [], []>} : vector<16x32xf32>, vector<32x256xf32>, vector<16x256xf32> -> vector<16x256xf32>
    %c0_18 = arith.constant 0 : index
    %c0_19 = arith.constant 0 : index
    %33 = vector.load %arg6[%c0_18, %c0_19] : memref<16x1xf32, #tpu.memory_space<vmem>>, vector<16x1xf32>
    %34 = vector.broadcast %33 : vector<16x1xf32> to vector<16x256xf32>
    %35 = arith.addf %32, %34 : vector<16x256xf32>
    %cst_20 = arith.constant dense<0.000000e+00> : vector<16xf32>
    %36 = vector.multi_reduction <add>, %35, %cst_20 [1] : vector<16x256xf32> to vector<16xf32>
    %37 = vector.shape_cast %36 : vector<16xf32> to vector<16x1xf32>
    %cst_21 = arith.constant 2.560000e+02 : f32
    %38 = vector.broadcast %cst_21 : f32 to vector<16x1xf32>
    %39 = arith.divf %37, %38 : vector<16x1xf32>
    %40 = vector.broadcast %39 : vector<16x1xf32> to vector<16x256xf32>
    %41 = arith.subf %35, %40 : vector<16x256xf32>
    %42 = arith.mulf %41, %41 : vector<16x256xf32>
    %cst_22 = arith.constant dense<0.000000e+00> : vector<16xf32>
    %43 = vector.multi_reduction <add>, %42, %cst_22 [1] : vector<16x256xf32> to vector<16xf32>
    %44 = vector.shape_cast %43 : vector<16xf32> to vector<16x1xf32>
    %cst_23 = arith.constant 2.560000e+02 : f32
    %45 = vector.broadcast %cst_23 : f32 to vector<16x1xf32>
    %46 = arith.divf %44, %45 : vector<16x1xf32>
    %c0_24 = arith.constant 0 : index
    %c0_25 = arith.constant 0 : index
    %47 = vector.load %arg7[%c0_24, %c0_25] : memref<16x1xf32, #tpu.memory_space<vmem>>, vector<16x1xf32>
    %cst_26 = arith.constant 9.99999974E-6 : f32
    %48 = vector.broadcast %cst_26 : f32 to vector<16x1xf32>
    %49 = arith.addf %46, %48 : vector<16x1xf32>
    %50 = math.rsqrt %49 : vector<16x1xf32>
    %51 = arith.mulf %47, %50 : vector<16x1xf32>
    %c0_27 = arith.constant 0 : index
    %c0_28 = arith.constant 0 : index
    %52 = vector.load %arg8[%c0_27, %c0_28] : memref<16x1xf32, #tpu.memory_space<vmem>>, vector<16x1xf32>
    %53 = arith.mulf %39, %51 : vector<16x1xf32>
    %54 = arith.subf %52, %53 : vector<16x1xf32>
    %55 = vector.broadcast %51 : vector<16x1xf32> to vector<16x256xf32>
    %56 = arith.mulf %35, %55 : vector<16x256xf32>
    %57 = vector.broadcast %54 : vector<16x1xf32> to vector<16x256xf32>
    %58 = arith.addf %56, %57 : vector<16x256xf32>
    %cst_29 = arith.constant 0.000000e+00 : f32
    %59 = vector.broadcast %cst_29 : f32 to vector<16x256xf32>
    %60 = arith.maximumf %58, %59 : vector<16x256xf32>
    %c0_30 = arith.constant 0 : index
    %c0_31 = arith.constant 0 : index
    %61 = vector.load %arg9[%c0_30, %c0_31] : memref<8x16xf32, #tpu.memory_space<vmem>>, vector<8x16xf32>
    %cst_32 = arith.constant dense<0.000000e+00> : vector<8x256xf32>
    %62 = tpu.matmul %61, %60, %cst_32 {dimension_numbers = #tpu.dot_dimension_numbers<[1], [0], [0], [1], [0, 0, 1, 1], [], []>} : vector<8x16xf32>, vector<16x256xf32>, vector<8x256xf32> -> vector<8x256xf32>
    %c0_33 = arith.constant 0 : index
    %c0_34 = arith.constant 0 : index
    %63 = vector.load %arg10[%c0_33, %c0_34] : memref<8x1xf32, #tpu.memory_space<vmem>>, vector<8x1xf32>
    %64 = vector.broadcast %63 : vector<8x1xf32> to vector<8x256xf32>
    %65 = arith.addf %62, %64 : vector<8x256xf32>
    %cst_35 = arith.constant dense<0.000000e+00> : vector<8xf32>
    %66 = vector.multi_reduction <add>, %65, %cst_35 [1] : vector<8x256xf32> to vector<8xf32>
    %67 = vector.shape_cast %66 : vector<8xf32> to vector<8x1xf32>
    %cst_36 = arith.constant 2.560000e+02 : f32
    %68 = vector.broadcast %cst_36 : f32 to vector<8x1xf32>
    %69 = arith.divf %67, %68 : vector<8x1xf32>
    %70 = vector.broadcast %69 : vector<8x1xf32> to vector<8x256xf32>
    %71 = arith.subf %65, %70 : vector<8x256xf32>
    %72 = arith.mulf %71, %71 : vector<8x256xf32>
    %cst_37 = arith.constant dense<0.000000e+00> : vector<8xf32>
    %73 = vector.multi_reduction <add>, %72, %cst_37 [1] : vector<8x256xf32> to vector<8xf32>
    %74 = vector.shape_cast %73 : vector<8xf32> to vector<8x1xf32>
    %cst_38 = arith.constant 2.560000e+02 : f32
    %75 = vector.broadcast %cst_38 : f32 to vector<8x1xf32>
    %76 = arith.divf %74, %75 : vector<8x1xf32>
    %c0_39 = arith.constant 0 : index
    %c0_40 = arith.constant 0 : index
    %77 = vector.load %arg11[%c0_39, %c0_40] : memref<8x1xf32, #tpu.memory_space<vmem>>, vector<8x1xf32>
    %cst_41 = arith.constant 9.99999974E-6 : f32
    %78 = vector.broadcast %cst_41 : f32 to vector<8x1xf32>
    %79 = arith.addf %76, %78 : vector<8x1xf32>
    %80 = math.rsqrt %79 : vector<8x1xf32>
    %81 = arith.mulf %77, %80 : vector<8x1xf32>
    %c0_42 = arith.constant 0 : index
    %c0_43 = arith.constant 0 : index
    %82 = vector.load %arg12[%c0_42, %c0_43] : memref<8x1xf32, #tpu.memory_space<vmem>>, vector<8x1xf32>
    %83 = arith.mulf %69, %81 : vector<8x1xf32>
    %84 = arith.subf %82, %83 : vector<8x1xf32>
    %85 = vector.broadcast %81 : vector<8x1xf32> to vector<8x256xf32>
    %86 = arith.mulf %65, %85 : vector<8x256xf32>
    %87 = vector.broadcast %84 : vector<8x1xf32> to vector<8x256xf32>
    %88 = arith.addf %86, %87 : vector<8x256xf32>
    %cst_44 = arith.constant 0.000000e+00 : f32
    %89 = vector.broadcast %cst_44 : f32 to vector<8x256xf32>
    %90 = arith.maximumf %88, %89 : vector<8x256xf32>
    %c0_45 = arith.constant 0 : index
    %c0_46 = arith.constant 0 : index
    %91 = vector.load %arg13[%c0_45, %c0_46] : memref<8x8xf32, #tpu.memory_space<vmem>>, vector<8x8xf32>
    %cst_47 = arith.constant dense<0.000000e+00> : vector<8x256xf32>
    %92 = tpu.matmul %91, %90, %cst_47 {dimension_numbers = #tpu.dot_dimension_numbers<[1], [0], [0], [1], [0, 0, 1, 1], [], []>} : vector<8x8xf32>, vector<8x256xf32>, vector<8x256xf32> -> vector<8x256xf32>
    %c0_48 = arith.constant 0 : index
    %c0_49 = arith.constant 0 : index
    %93 = vector.load %arg14[%c0_48, %c0_49] : memref<8x1xf32, #tpu.memory_space<vmem>>, vector<8x1xf32>
    %94 = vector.broadcast %93 : vector<8x1xf32> to vector<8x256xf32>
    %95 = arith.addf %92, %94 : vector<8x256xf32>
    %96 = math.tanh %95 : vector<8x256xf32>
    %c0_50 = arith.constant 0 : index
    %c0_51 = arith.constant 0 : index
    %97 = vector.load %arg15[%c0_50, %c0_51] : memref<8x256xf32, #tpu.memory_space<vmem>>, vector<8x256xf32>
    tpu.vector_store %arg15[%c0_50, %c0_51], %96 {strides = array<i32>} : memref<8x256xf32, #tpu.memory_space<vmem>>, vector<8x256xf32>,
    return
  }
}

</mosaic_0001>

<bundles_post_ra>
// kernel: tpu_custom_call.1
= control target key start
LH: loop header
LB: loop body
LE: loop exit
PB: predicated region body
PF: predicated region fallthrough
CT: control target
= control target key end

     0   :  { %v767_v4 = vmov 0.0   ;;  %v768_v6 = vmov 0   ;;  %s1021_s0 = inlined_call_operand.vmem [shape: f32[32,256], index: 0, kind: input, shape index: {}]   ;;  %s1022_s1 = inlined_call_operand.vmem [shape: f32[32,32], index: 1, kind: input, shape index: {}]   ;;  %s1023_s2 = inlined_call_operand.vmem [shape: f32[32,1], index: 2, kind: input, shape index: {}]   ;;  %s1024_s3 = inlined_call_operand.vmem [shape: f32[32,1], index: 3, kind: input, shape index: {}]   ;;  %s1025_s4 = inlined_call_operand.vmem [shape: f32[32,1], index: 4, kind: input, shape index: {}]   ;;  %s1026_s5 = inlined_call_operand.vmem [shape: f32[16,32], index: 5, kind: input, shape index: {}]   ;;  %s1027_s6 = inlined_call_operand.vmem [shape: f32[16,1], index: 6, kind: input, shape index: {}]   ;;  %s1028_s7 = inlined_call_operand.vmem [shape: f32[16,1], index: 7, kind: input, shape index: {}]   ;;  %s1029_s8 = inlined_call_operand.vmem [shape: f32[16,1], index: 8, kind: input, shape index: {}]   ;;  %s1030_s9 = inlined_call_operand.vmem [shape: f32[8,16], index: 9, kind: input, shape index: {}]   ;;  %s1031_s10 = inlined_call_operand.vmem [shape: f32[8,1], index: 10, kind: input, shape index: {}]   ;;  %s1032_s11 = inlined_call_operand.vmem [shape: f32[8,1], index: 11, kind: input, shape index: {}]   ;;  %s1033_s12 = inlined_call_operand.vmem [shape: f32[8,1], index: 12, kind: input, shape index: {}]   ;;  %s1034_s13 = inlined_call_operand.vmem [shape: f32[8,8], index: 13, kind: input, shape index: {}]   ;;  %s1035_s14 = inlined_call_operand.vmem [shape: f32[8,1], index: 14, kind: input, shape index: {}]   ;;  %s1036_s15 = inlined_call_operand.hbm [shape: f32[8,256], index: 15, kind: output, shape index: {}]  }
   0x1   :  { %v58_v0 = vld [vmem:[%s1021_s0 + $0x38] sm:$0xff]  ;;  %v57_v1 = vld [vmem:[%s1021_s0 + $0x30] sm:$0xff]  ;;  %v56_v2 = vld [vmem:[%s1021_s0 + $0x28] sm:$0xff]  ;;  %164 = vmatprep.mubr.f32.mxu0 %v767_v4  ;;  %726 = vset.pattern.permute.xlu1 %v768_v6 }
   0x2   :  { %124 = vmatprep.subr.mxu0 %v58_v0  ;;  %v55_v3 = vld [vmem:[%s1021_s0 + $0x20] sm:$0xff]  ;;  %v54_v5 = vld [vmem:[%s1021_s0 + $0x18] sm:$0xff]  ;;  %v53_v7 = vld [vmem:[%s1021_s0 + $0x10] sm:$0xff]  ;;  %725 = vset.pattern.permute.xlu0 %v768_v6 }
   0x3   :  { %125 = vmatpush1.msra.mxu0 %v57_v1  ;;  %v52_v8 = vld [vmem:[%s1021_s0 + $0x8] sm:$0xff]  ;;  %v66_v10 = vld [vmem:[%s1023_s2 + $0x18] sm:$0xff]  ;;  %414 = vmatprep.mubr.f32.mxu1 %v767_v4  ;;  %v51_v11 = vld [vmem:[%s1021_s0] sm:$0xff] }
   0x4   :  { %126 = vmatprep.subr.mxu0 %v56_v2  ;;  %v64_v9 = vld [vmem:[%s1023_s2 + $0x8] sm:$0xff] }
   0x5   :  { %127 = vmatpush1.msra.mxu0 %v55_v3  ;;  %74 = vperm.xlu1 %726, %v64_v9  }
   0x6   :  { %128 = vmatprep.subr.mxu0 %v54_v5 }
   0x7   :  { %20 = vsyncpa [#allocation3], 0  ;;  %129 = vmatpush1.msra.mxu0 %v53_v7  ;;  %v59_v12 = vld [vmem:[%s1022_s1] sm:$0xff]  ;;  %vm87_vm0 = vcmask 261120   ;;  %84 = vperm.xlu0 %725, %v66_v10   ;;  %v65_v14 = vld [vmem:[%s1023_s2 + $0x10] sm:$0xff]  ;;  %vm504_vm1 = vcmask 130048  }
   0x8   :  { %v63_v13 = vld [vmem:[%s1023_s2] sm:$0xff]  ;;  %130 = vmatprep.subr.mxu0 %v52_v8  ;;  %v60_v15 = vld [vmem:[%s1022_s1 + $0x8] sm:$0xff]  ;;  %v61_v16 = vld [vmem:[%s1022_s1 + $0x10] sm:$0xff]  ;;  %vm621_vm2 = vcmask 64512  }
   0x9   :  { %131 = vmatpush1.msra.mxu0 %v51_v11  ;;  %69 = vperm.xlu1 %726, %v63_v13   ;;  %v62_v17 = vld [vmem:[%s1022_s1 + $0x18] sm:$0xff] }
   0xa   :  { %714 = vmatmul.mubr.msk.f32.vlgmr.msra.gmra.mxu0 %vm87_vm0, %v59_v12 }
   0xb   :  { %170 = vmatprep.mubr.f32.mxu0 %v767_v4  ;;  %79 = vperm.xlu0 %725, %v65_v14  }
   0xe   :  { %715 = vmatmul.mubr.msk.f32.gmra.mxu0 %vm87_vm0, %v60_v15 }
   0xf   :  { %176 = vmatprep.mubr.f32.mxu0 %v767_v4 }
  0x12   :  { %716 = vmatmul.mubr.msk.f32.gmra.mxu0 %vm87_vm0, %v61_v16 }
  0x13   :  { %182 = vmatprep.mubr.f32.mxu0 %v767_v4 }
  0x16   :  { %717 = vmatmul.mubr.msk.f32.gmra.mxu0 %vm87_vm0, %v62_v17 }
  0x80   :  { %v75_v30 = vpop.permute.xlu1 %74 }
  0x82   :  { %v85_v20 = vpop.permute.xlu0 %84 }
  0x84   :  { %v70_v37 = vpop.permute.xlu1 %69 }
  0x86   :  { %v80_v23 = vpop.permute.xlu0 %79 }
  0xca   :  { %v166_v18 = vpop.f32.mrf.mxu0 }
  0xcb   :  { %v927_v40 = vadd.f32 %v166_v18, %v70_v37 }
  0xcc   :  { %v168_v19 = vpop.f32.mrf.mxu0 }
  0xcd   :  { %v923_v38 = vadd.f32 %v168_v19, %v70_v37  ;;  %v240_v19 = vld [vmem:[%s1024_s3 + $0x10] sm:$0xff]  ;;  %v255_v37 = vld [vmem:[%s1025_s4 + $0x8] sm:$0xff] }
  0xce   :  { %v172_v21 = vpop.f32.mrf.mxu0 }
  0xcf   :  { %v921_v36 = vadd.f32 %v172_v21, %v75_v30  ;;  %v189_v41 = vadd.f32 %v923_v38, %v927_v40 }
  0xd0   :  { %v174_v22 = vpop.f32.mrf.mxu0 }
  0xd1   :  { %v917_v34 = vadd.f32 %v174_v22, %v75_v30  ;;  %v256_v22 = vld [vmem:[%s1025_s4 + $0x10] sm:$0xff] }
  0xd2   :  { %v178_v24 = vpop.f32.mrf.mxu0 }
  0xd3   :  { %v907_v26 = vadd.f32 %v178_v24, %v80_v23  ;;  %v192_v39 = vadd.f32 %v917_v34, %v921_v36 }
  0xd4   :  { %v180_v25 = vpop.f32.mrf.mxu0 }
  0xd5   :  { %v909_v27 = vadd.f32 %v180_v25, %v80_v23 }
  0xd6   :  { %v184_v28 = vpop.f32.mrf.mxu0 }
  0xd7   :  { %v195_v29 = vadd.f32 %v909_v27, %v907_v26  ;;  %v913_v32 = vadd.f32 %v184_v28, %v85_v20  ;;  %v239_v28 = vld [vmem:[%s1024_s3 + $0x8] sm:$0xff] }
  0xd8   :  { %v186_v31 = vpop.f32.mrf.mxu0 }
  0xd9   :  { %v915_v33 = vadd.f32 %v186_v31, %v85_v20  ;;  %196 = vadd.xlane.f32.xlu1 %v195_v29  ;;  %v241_v29 = vld [vmem:[%s1024_s3 + $0x18] sm:$0xff] }
  0xdb   :  { %v198_v35 = vadd.f32 %v915_v33, %v913_v32 }
  0xdd   :  { %199 = vadd.xlane.f32.xlu0 %v198_v35 }
  0xe1   :  { %193 = vadd.xlane.f32.xlu0 %v192_v39 }
  0xe5   :  { %190 = vadd.xlane.f32.xlu0 %v189_v41 }
 0x162   :  { %v197_v42 = vpop.xlane.xlu1 %196 }
 0x163   :  { %v204_v43 = vmul.f32 0.00390625, %v197_v42 }
 0x165   :  { %v210_v44 = vsub.f32 %v907_v26, %v204_v43  ;;  %v211_v45 = vsub.f32 %v909_v27, %v204_v43 }
 0x166   :  { %v200_v46 = vpop.xlane.xlu0 %199 }
 0x167   :  { %v205_v47 = vmul.f32 0.00390625, %v200_v46  ;;  %v218_v48 = vmul.f32 %v210_v44, %v210_v44  ;;  %v219_v49 = vmul.f32 %v211_v45, %v211_v45  ;;  %v257_v44 = vld [vmem:[%s1025_s4 + $0x18] sm:$0xff]  ;;  %v238_v45 = vld [vmem:[%s1024_s3] sm:$0xff]  ;;  %v333_v46 = vld [vmem:[%s1027_s6 + $0x8] sm:$0xff] }
 0x169   :  { %v228_v50 = vadd.f32 %v219_v49, %v218_v48  ;;  %v212_v51 = vsub.f32 %v913_v32, %v205_v47  ;;  %v213_v52 = vsub.f32 %v915_v33, %v205_v47 }
 0x16a   :  { %v194_v53 = vpop.xlane.xlu0 %193 }
 0x16b   :  { %v203_v54 = vmul.f32 0.00390625, %v194_v53  ;;  %229 = vadd.xlane.f32.xlu0 %v228_v50  ;;  %v220_v55 = vmul.f32 %v212_v51, %v212_v51  ;;  %v221_v56 = vmul.f32 %v213_v52, %v213_v52  ;;  %v254_v50 = vld [vmem:[%s1025_s4] sm:$0xff] }
 0x16c   :  { %v332_v52 = vld [vmem:[%s1027_s6] sm:$0xff] }
 0x16d   :  { %v231_v57 = vadd.f32 %v221_v56, %v220_v55  ;;  %v208_v58 = vsub.f32 %v921_v36, %v203_v54  ;;  %v209_v59 = vsub.f32 %v917_v34, %v203_v54 }
 0x16e   :  { %v191_v60 = vpop.xlane.xlu0 %190 }
 0x16f   :  { %v202_v61 = vmul.f32 0.00390625, %v191_v60  ;;  %232 = vadd.xlane.f32.xlu1 %v231_v57  ;;  %v216_v62 = vmul.f32 %v208_v58, %v208_v58  ;;  %v217_v63 = vmul.f32 %v209_v59, %v209_v59 }
 0x171   :  { %v225_v0 = vadd.f32 %v217_v63, %v216_v62  ;;  %v206_v1 = vsub.f32 %v927_v40, %v202_v61  ;;  %v207_v2 = vsub.f32 %v923_v38, %v202_v61 }
 0x173   :  { %226 = vadd.xlane.f32.xlu1 %v225_v0  ;;  %v214_v3 = vmul.f32 %v206_v1, %v206_v1  ;;  %v215_v5 = vmul.f32 %v207_v2, %v207_v2 }
 0x175   :  { %v222_v6 = vadd.f32 %v215_v5, %v214_v3 }
 0x177   :  { %223 = vadd.xlane.f32.xlu0 %v222_v6 }
 0x1f4   :  { %v230_v7 = vpop.xlane.xlu0 %229 }
 0x1f5   :  { %v236_v8 = vmul.f32 0.00390625, %v230_v7 }
 0x1f7   :  { %v244_v9 = vadd.f32 1e-05, %v236_v8 }
 0x1f8   :  { %v233_v10 = vpop.xlane.xlu1 %232 }
 0x1f9   :  { %727 = vrsqrt.f32 %v244_v9  ;;  %v237_v11 = vmul.f32 0.00390625, %v233_v10 }
 0x1fb   :  { %v245_v12 = vadd.f32 1e-05, %v237_v11 }
 0x1fc   :  { %v227_v13 = vpop.xlane.xlu1 %226 }
 0x1fd   :  { %v235_v14 = vmul.f32 0.00390625, %v227_v13  ;;  %729 = vrsqrt.f32 %v245_v12 }
 0x1ff   :  { %v243_v15 = vadd.f32 1e-05, %v235_v14 }
 0x200   :  { %v224_v16 = vpop.xlane.xlu0 %223 }
 0x201   :  { %731 = vrsqrt.f32 %v243_v15  ;;  %v234_v17 = vmul.f32 0.00390625, %v224_v16  ;;  %v330_v16 = vld [vmem:[%s1026_s5] sm:$0xff] }
 0x203   :  { %v242_v18 = vadd.f32 1e-05, %v234_v17 }
 0x205   :  { %733 = vrsqrt.f32 %v242_v18 }
 0x206   :  { %v728_v20 = vpop.eup %727 }
 0x207   :  { %v252_v21 = vmul.f32 %v728_v20, %v240_v19 }
 0x209   :  { %278 = vperm.xlu0 %725, %v252_v21   ;;  %v260_v23 = vmul.f32 %v252_v21, %v204_v43 }
 0x20a   :  { %v730_v25 = vpop.eup %729 }
 0x20b   :  { %v264_v24 = vsub.f32 %v256_v22, %v260_v23  ;;  %v253_v35 = vmul.f32 %v730_v25, %v241_v29 }
 0x20d   :  { %306 = vperm.xlu0 %725, %v264_v24   ;;  %v261_v42 = vmul.f32 %v253_v35, %v205_v47 }
 0x20e   :  { %v732_v30 = vpop.eup %731 }
 0x20f   :  { %v251_v31 = vmul.f32 %v732_v30, %v239_v28  ;;  %v265_v48 = vsub.f32 %v257_v44, %v261_v42 }
 0x211   :  { %273 = vperm.xlu1 %726, %v251_v31   ;;  %v259_v39 = vmul.f32 %v251_v31, %v203_v54 }
 0x212   :  { %v734_v43 = vpop.eup %733 }
 0x213   :  { %v263_v41 = vsub.f32 %v255_v37, %v259_v39  ;;  %v250_v49 = vmul.f32 %v734_v43, %v238_v45 }
 0x215   :  { %283 = vperm.xlu1 %726, %v253_v35   ;;  %301 = vperm.xlu0 %725, %v263_v41   ;;  %v258_v47 = vmul.f32 %v250_v49, %v202_v61 }
 0x217   :  { %v262_v51 = vsub.f32 %v254_v50, %v258_v47 }
 0x219   :  { %311 = vperm.xlu1 %726, %v265_v48   ;;  %341 = vperm.xlu0 %725, %v333_v46  }
 0x21d   :  { %268 = vperm.xlu1 %726, %v250_v49  }
 0x221   :  { %296 = vperm.xlu1 %726, %v262_v51  }
 0x225   :  { %336 = vperm.xlu1 %726, %v332_v52  }
 0x284   :  { %v279_v53 = vpop.permute.xlu0 %278 }
 0x285   :  { %v291_v57 = vmul.f32 %v279_v53, %v909_v27  ;;  %v290_v60 = vmul.f32 %v279_v53, %v907_v26 }
 0x288   :  { %v307_v55 = vpop.permute.xlu0 %306 }
 0x289   :  { %v319_v63 = vadd.f32 %v307_v55, %v291_v57  ;;  %v318_v3 = vadd.f32 %v307_v55, %v290_v60  ;;  %v451_v60 = vld [vmem:[%s1028_s7] sm:$0xff] }
 0x28c   :  { %v274_v54 = vpop.permute.xlu1 %273 }
 0x28d   :  { %v289_v0 = vmul.f32 %v274_v54, %v917_v34  ;;  %v288_v5 = vmul.f32 %v274_v54, %v921_v36 }
 0x290   :  { %v284_v56 = vpop.permute.xlu1 %283  ;;  %v302_v61 = vpop.permute.xlu0 %301 }
 0x291   :  { %v292_v58 = vmul.f32 %v284_v56, %v913_v32  ;;  %v293_v59 = vmul.f32 %v284_v56, %v915_v33  ;;  %v317_v6 = vadd.f32 %v302_v61, %v289_v0  ;;  %v316_v27 = vadd.f32 %v302_v61, %v288_v5  ;;  %v452_v56 = vld [vmem:[%s1028_s7 + $0x8] sm:$0xff] }
 0x292   :  { %v327_v32 = vmax.f32 %v319_v63, 0.0  ;;  %v326_v33 = vmax.f32 %v318_v3, 0.0  ;;  %v498_v3 = vld [vmem:[%s1031_s10] sm:$0xff] }
 0x293   :  { %v325_v26 = vmax.f32 %v317_v6, 0.0  ;;  %v324_v34 = vmax.f32 %v316_v27, 0.0 }
 0x294   :  { %v312_v62 = vpop.permute.xlu1 %311  ;;  %v342_v23 = vpop.permute.xlu0 %341 }
 0x295   :  { %v320_v1 = vadd.f32 %v312_v62, %v292_v58  ;;  %v321_v2 = vadd.f32 %v312_v62, %v293_v59  ;;  %v460_v59 = vld [vmem:[%s1029_s8 + $0x8] sm:$0xff] }
 0x297   :  { %v329_v7 = vmax.f32 %v321_v2, 0.0  ;;  %v328_v8 = vmax.f32 %v320_v1, 0.0  ;;  %v459_v1 = vld [vmem:[%s1029_s8] sm:$0xff] }
 0x298   :  { %v269_v9 = vpop.permute.xlu1 %268 }
 0x299   :  { %374 = vmatprep.subr.mxu1 %v329_v7  ;;  %v286_v10 = vmul.f32 %v269_v9, %v927_v40  ;;  %v287_v11 = vmul.f32 %v269_v9, %v923_v38  ;;  %v331_v38 = vld [vmem:[%s1026_s5 + $0x8] sm:$0xff] }
 0x29a   :  { %375 = vmatpush1.msra.mxu1 %v328_v8 }
 0x29b   :  { %376 = vmatprep.subr.mxu1 %v327_v32 }
 0x29c   :  { %v297_v12 = vpop.permute.xlu1 %296  ;;  %377 = vmatpush1.msra.mxu1 %v326_v33 }
 0x29d   :  { %v314_v13 = vadd.f32 %v297_v12, %v286_v10  ;;  %v315_v36 = vadd.f32 %v297_v12, %v287_v11  ;;  %378 = vmatprep.subr.mxu1 %v325_v26 }
 0x29e   :  { %379 = vmatpush1.msra.mxu1 %v324_v34 }
 0x29f   :  { %v322_v14 = vmax.f32 %v314_v13, 0.0  ;;  %v323_v15 = vmax.f32 %v315_v36, 0.0 }
 0x2a0   :  { %v337_v17 = vpop.permute.xlu1 %336 }
 0x2a1   :  { %380 = vmatprep.subr.mxu1 %v323_v15 }
 0x2a2   :  { %381 = vmatpush1.msra.mxu1 %v322_v14 }
 0x2a3   :  { %718 = vmatmul.mubr.msk.f32.vlgmr.msra.gmra.mxu1 %vm87_vm0, %v330_v16  ;;  %v497_v16 = vld [vmem:[%s1030_s9] sm:$0xff] }
 0x2a4   :  { %420 = vmatprep.mubr.f32.mxu1 %v767_v4 }
 0x2a7   :  { %719 = vmatmul.mubr.msk.f32.gmra.mxu1 %vm87_vm0, %v331_v38 }
 0x2a8   :  { %572 = vmatprep.mubr.f32.mxu1 %v767_v4 }
 0x363   :  { %v416_v40 = vpop.f32.mrf.mxu1 }
 0x364   :  { %v417_v19 = vadd.f32 %v416_v40, %v337_v17 }
 0x365   :  { %v418_v18 = vpop.f32.mrf.mxu1 }
 0x366   :  { %v419_v20 = vadd.f32 %v418_v18, %v337_v17 }
 0x367   :  { %v422_v21 = vpop.f32.mrf.mxu1 }
 0x368   :  { %v427_v22 = vadd.f32 %v419_v20, %v417_v19  ;;  %v423_v25 = vadd.f32 %v422_v21, %v342_v23 }
 0x369   :  { %v424_v24 = vpop.f32.mrf.mxu1 }
 0x36a   :  { %v425_v28 = vadd.f32 %v424_v24, %v342_v23  ;;  %428 = vadd.xlane.f32.xlu1 %v427_v22 }
 0x36c   :  { %v430_v29 = vadd.f32 %v425_v28, %v423_v25 }
 0x36e   :  { %431 = vadd.xlane.f32.xlu0 %v430_v29 }
 0x3f3   :  { %v429_v30 = vpop.xlane.xlu1 %428 }
 0x3f4   :  { %v433_v31 = vmul.f32 0.00390625, %v429_v30 }
 0x3f6   :  { %v435_v42 = vsub.f32 %v417_v19, %v433_v31  ;;  %v436_v43 = vsub.f32 %v419_v20, %v433_v31 }
 0x3f7   :  { %v432_v35 = vpop.xlane.xlu0 %431 }
 0x3f8   :  { %v434_v37 = vmul.f32 0.00390625, %v432_v35  ;;  %v439_v48 = vmul.f32 %v435_v42, %v435_v42  ;;  %v440_v49 = vmul.f32 %v436_v43, %v436_v43 }
 0x3fa   :  { %v437_v39 = vsub.f32 %v423_v25, %v434_v37  ;;  %v438_v41 = vsub.f32 %v425_v28, %v434_v37  ;;  %v443_v47 = vadd.f32 %v440_v49, %v439_v48 }
 0x3fc   :  { %v441_v44 = vmul.f32 %v437_v39, %v437_v39  ;;  %v442_v45 = vmul.f32 %v438_v41, %v438_v41  ;;  %v595_v41 = vld [vmem:[%s1033_s12] sm:$0xff]  ;;  %s769_s12 = smov [#allocation2]  }
 0x3fe   :  { %v446_v46 = vadd.f32 %v442_v45, %v441_v44  ;;  %v615_v44 = vld [vmem:[%s1035_s14] sm:$0xff]  ;;  %s706_s14 = sshll.u32 %s769_s12, 4  ;;  %s707_s14 = int_to_ptr.vmem [resolvable:$true] %s706_s14 }
 0x3ff   :  { %s745_s17 = scalar_lea.vmem %s707_s14, 256  ;;  %p750_p1 = scmp.lt.s32.totalorder %s707_s14, %s707_s14 }
 0x400   :  { %447 = vadd.xlane.f32.xlu0 %v446_v46  ;;  %p746_p0 = scmp.ne.s32.totalorder %s707_s14, %s745_s17  ;;  %p751_p2 = scmp.lt.s32.totalorder %s745_s17, %s745_s17 }
 0x402   :  { %p752_p3 = por %p751_p2, %p750_p1 }
 0x404   :  { %444 = vadd.xlane.f32.xlu0 %v443_v47  ;;  %p753_p4 = pnand %p752_p3, %p746_p0 }
 0x489   :  { %v448_v50 = vpop.xlane.xlu0 %447 }
 0x48a   :  { %v450_v51 = vmul.f32 0.00390625, %v448_v50 }
 0x48c   :  { %v454_v52 = vadd.f32 1e-05, %v450_v51 }
 0x48d   :  { %v445_v53 = vpop.xlane.xlu0 %444 }
 0x48e   :  { %735 = vrsqrt.f32 %v454_v52  ;;  %v449_v54 = vmul.f32 0.00390625, %v445_v53  ;;  %v614_v53 = vld [vmem:[%s1034_s13] sm:$0xff] }
 0x490   :  { %v453_v55 = vadd.f32 1e-05, %v449_v54 }
 0x492   :  { %737 = vrsqrt.f32 %v453_v55 }
 0x49b   :  { %v736_v57 = vpop.eup %735 }
 0x49c   :  { %v458_v58 = vmul.f32 %v736_v57, %v452_v56 }
 0x49e   :  { %472 = vperm.xlu1 %726, %v458_v58   ;;  %v462_v61 = vmul.f32 %v458_v58, %v434_v37 }
 0x49f   :  { %v738_v62 = vpop.eup %737 }
 0x4a0   :  { %v464_v63 = vsub.f32 %v460_v59, %v462_v61  ;;  %v457_v0 = vmul.f32 %v738_v62, %v451_v60 }
 0x4a2   :  { %486 = vperm.xlu1 %726, %v464_v63   ;;  %467 = vperm.xlu0 %725, %v457_v0   ;;  %v461_v2 = vmul.f32 %v457_v0, %v433_v31 }
 0x4a4   :  { %v463_v5 = vsub.f32 %v459_v1, %v461_v2 }
 0x4a6   :  { %501 = vperm.xlu0 %725, %v498_v3   ;;  %481 = vperm.xlu1 %726, %v463_v5  }
 0x519   :  { %v473_v6 = vpop.permute.xlu1 %472 }
 0x51a   :  { %v477_v7 = vmul.f32 %v473_v6, %v423_v25  ;;  %v478_v8 = vmul.f32 %v473_v6, %v425_v28 }
 0x51d   :  { %v487_v27 = vpop.permute.xlu1 %486  ;;  %v468_v9 = vpop.permute.xlu0 %467 }
 0x51e   :  { %v491_v32 = vadd.f32 %v487_v27, %v477_v7  ;;  %v492_v33 = vadd.f32 %v487_v27, %v478_v8  ;;  %v475_v11 = vmul.f32 %v468_v9, %v417_v19  ;;  %v476_v34 = vmul.f32 %v468_v9, %v419_v20 }
 0x520   :  { %v495_v26 = vmax.f32 %v491_v32, 0.0  ;;  %v496_v10 = vmax.f32 %v492_v33, 0.0 }
 0x521   :  { %v482_v12 = vpop.permute.xlu1 %481  ;;  %v502_v40 = vpop.permute.xlu0 %501 }
 0x522   :  { %v489_v13 = vadd.f32 %v482_v12, %v475_v11  ;;  %v490_v36 = vadd.f32 %v482_v12, %v476_v34  ;;  %536 = vmatprep.subr.mxu1 %v496_v10 }
 0x523   :  { %537 = vmatpush1.msra.mxu1 %v495_v26 }
 0x524   :  { %v493_v14 = vmax.f32 %v489_v13, 0.0  ;;  %v494_v15 = vmax.f32 %v490_v36, 0.0 }
 0x526   :  { %538 = vmatprep.subr.mxu1 %v494_v15 }
 0x527   :  { %539 = vmatpush1.msra.mxu1 %v493_v14 }
 0x528   :  { %720 = vmatmul.mubr.msk.f32.vlgmr.msra.gmra.mxu1 %vm504_vm1, %v497_v16 }
 0x529   :  { %689 = vmatprep.mubr.f32.mxu1 %v767_v4  ;;  %v591_v4 = vld [vmem:[%s1032_s11] sm:$0xff] }
 0x5e8   :  { %v574_v38 = vpop.f32.mrf.mxu1 }
 0x5e9   :  { %v575_v18 = vadd.f32 %v574_v38, %v502_v40 }
 0x5ea   :  { %v576_v17 = vpop.f32.mrf.mxu1 }
 0x5eb   :  { %v577_v19 = vadd.f32 %v576_v17, %v502_v40 }
 0x5ed   :  { %v579_v20 = vadd.f32 %v577_v19, %v575_v18 }
 0x5ef   :  { %580 = vadd.xlane.f32.xlu1 %v579_v20 }
 0x678   :  { %v581_v21 = vpop.xlane.xlu1 %580 }
 0x679   :  { %v582_v22 = vmul.f32 0.00390625, %v581_v21 }
 0x67b   :  { %v583_v23 = vsub.f32 %v575_v18, %v582_v22  ;;  %v584_v24 = vsub.f32 %v577_v19, %v582_v22 }
 0x67d   :  { %v585_v25 = vmul.f32 %v583_v23, %v583_v23  ;;  %v586_v28 = vmul.f32 %v584_v24, %v584_v24 }
 0x67f   :  { %v587_v29 = vadd.f32 %v586_v28, %v585_v25 }
 0x681   :  { %588 = vadd.xlane.f32.xlu0 %v587_v29 }
 0x70a   :  { %v589_v30 = vpop.xlane.xlu0 %588 }
 0x70b   :  { %v590_v31 = vmul.f32 0.00390625, %v589_v30 }
 0x70d   :  { %v592_v35 = vadd.f32 1e-05, %v590_v31 }
 0x70f   :  { %739 = vrsqrt.f32 %v592_v35 }
 0x71c   :  { %v740_v37 = vpop.eup %739 }
 0x71d   :  { %v594_v39 = vmul.f32 %v740_v37, %v591_v4 }
 0x71f   :  { %600 = vperm.xlu0 %725, %v594_v39   ;;  %v596_v42 = vmul.f32 %v594_v39, %v582_v22 }
 0x721   :  { %v597_v43 = vsub.f32 %v595_v41, %v596_v42 }
 0x723   :  { %607 = vperm.xlu1 %726, %v597_v43  }
 0x727   :  { %618 = vperm.xlu1 %726, %v615_v44  }
 0x79a   :  { %v601_v45 = vpop.permute.xlu0 %600 }
 0x79b   :  { %v603_v46 = vmul.f32 %v601_v45, %v575_v18  ;;  %v604_v48 = vmul.f32 %v601_v45, %v577_v19 }
 0x79e   :  { %v608_v49 = vpop.permute.xlu1 %607 }
 0x79f   :  { %v610_v47 = vadd.f32 %v608_v49, %v603_v46  ;;  %v611_v50 = vadd.f32 %v608_v49, %v604_v48 }
 0x7a1   :  { %v612_v51 = vmax.f32 %v610_v47, 0.0  ;;  %v613_v52 = vmax.f32 %v611_v50, 0.0 }
 0x7a2   :  { %v619_v54 = vpop.permute.xlu1 %618 }
 0x7a3   :  { %655 = vmatprep.subr.mxu1 %v613_v52 }
 0x7a4   :  { %656 = vmatpush1.msra.mxu1 %v612_v51 }
 0x7a5   :  { %721 = vmatmul.mubr.msk.f32.vlgmr.msra.gmra.mxu1 %vm621_vm2, %v614_v53 }
 0x865   :  { %v691_v55 = vpop.f32.mrf.mxu1 }
 0x866   :  { %v692_v56 = vadd.f32 %v691_v55, %v619_v54 }
 0x867   :  { %v693_v57 = vpop.f32.mrf.mxu1 }
 0x868   :  { %741 = vtanh.f32 %v692_v56  ;;  %v694_v58 = vadd.f32 %v693_v57, %v619_v54 }
 0x86a   :  { %743 = vtanh.f32 %v694_v58 }
 0x875   :  { %v742_v59 = vpop.eup %741 }
 0x876   :  { %698 = vst [vmem:[#allocation2] sm:$0xff] %v742_v59 }
 0x877   :  { %v744_v60 = vpop.eup %743 }
 0x878   :  { %699 = vst [vmem:[#allocation2 + $0x8] sm:$0xff] %v744_v60 }
 0x879   :  { %756 = shalt.err (!%p753_p4)
}
 0x87a   :  { %709 = dma.vmem_to_hbm [thread:$0]  %s707_s14, 256, %s1036_s15, [#allocation3]  }
 0x87b   :  { %765 = dma.done.wait [#allocation3], 256  }
 0x87c   :  { %766 = vsyncadd [#allocation3], 4294967040 }
 0x87d   :  { %713 = vsyncpa [#allocation3], 1 }

</bundles_post_ra>
